<compile_context>
chip_gen: v7x
topology: tpu7x:2x2x1
jax: 0.10.0
libtpu: 0.0.40
codegen_flags: <defaults>
</compile_context>

<pallas_src>
import jax
import jax.numpy as jnp
from jax.experimental import pallas as pl
from jax.experimental.pallas import tpu as pltpu


def _round_up(n, m):
    return ((n + m - 1) // m) * m


def logistic_kernel(xp_ref, w_ref, b_ref, o_ref):
    """One batch tile of packed rows.

    xp_ref : (BMp, Fp) VMEM -- G original rows packed per row (lane-dense, Fp<=128)
    w_ref  : (G,  Fp)  VMEM -- row g = weight vector masked to lane segment g (resident)
    b_ref  : (1, 1)    SMEM -- bias scalar
    o_ref  : (BMp, G)  VMEM -- o[i, g] = sigmoid(<x[G*i + g, :], w> + b)
    """
    xp = xp_ref[...]                 # one tile load
    w_all = w_ref[...]               # tiny, resident across the whole grid
    bias = b_ref[0, 0]               # scalar read from SMEM
    G = o_ref.shape[-1]
    for g in range(G):               # static, fully unrolled (G <= 4)
        # Segmented GEMV on the VPU/XLU (no MXU): multiply by the segment-masked
        # weight row, reduce over lanes, f32 accumulation throughout.
        z = jnp.sum(xp * w_all[g:g + 1, :], axis=-1, keepdims=True) + bias
        # sigmoid via EUP exp + EUP approximate reciprocal (VALU stays free).
        o_ref[:, g:g + 1] = pl.reciprocal(1.0 + jnp.exp(-z), approx=True)


def logistic_regression(x, w, b, *, block_rows=16384):
    """Forward pass of LogisticRegression.

    x: (B, F) float32, w: (F, 1) float32, b: scalar/(1,)/(1,1) float32
    returns (B, 1) float32 == sigmoid(x @ w + b)
    """
    x = jnp.asarray(x, jnp.float32)
    w = jnp.asarray(w, jnp.float32)
    b = jnp.asarray(b, jnp.float32).reshape(1, 1)

    B, F = x.shape

    # Lane-packing factor: fold G = 128 // F consecutive rows into one 128-lane
    # row so every loaded vreg is fully occupied (F=32 would otherwise waste 3/4
    # of each lane group and 4x VMEM). Falls back to G=1 if F doesn't divide 128.
    G = 128 // F if (F <= 128 and 128 % F == 0) else 1
    Fp = G * F

    # Tile size in *original* rows per grid step; multiple of 8*G so the packed
    # block's sublane dim is a multiple of 8.  At block_rows=16384, F=32, f32:
    # x tile = 2 MiB, output tile = 64 KiB; double-buffered total ~4.3 MiB ->
    # comfortably inside 16 MiB (v5e) / 32 MiB (v6e, v7x) default scoped VMEM,
    # and big enough to amortize the ~0.35 us per-grid-step overhead.
    bm = min(block_rows, _round_up(B, 8 * G))
    bm = _round_up(bm, 8 * G)
    Bp = _round_up(B, bm)
    if Bp != B:
        x = jnp.pad(x, ((0, Bp - B), (0, 0)))

    # Free, row-major-contiguous reshape: packed row i holds original rows
    # G*i .. G*i+G-1 back-to-back along the lane axis.
    xp = x.reshape(Bp // G, Fp)

    # Segment-masked weight rows: w_rows[g, g*F:(g+1)*F] = w, zeros elsewhere.
    w_rows = (jnp.eye(G, dtype=jnp.float32)[:, :, None]
              * w.reshape(1, 1, F)).reshape(G, Fp)

    BMp = bm // G
    grid = (Bp // bm,)

    out = pl.pallas_call(
        logistic_kernel,
        out_shape=jax.ShapeDtypeStruct((Bp // G, G), jnp.float32),
        grid_spec=pltpu.PrefetchScalarGridSpec(
            num_scalar_prefetch=0,
            grid=grid,
            in_specs=[
                # Streaming batch tiles: double-buffered HBM->VMEM pipeline.
                pl.BlockSpec((BMp, Fp), lambda i: (i, 0)),
                # Weight rows: constant index map -> fetched once, stays resident.
                pl.BlockSpec((G, Fp), lambda i: (0, 0)),
                # Bias scalar lives in SMEM.
                pl.BlockSpec(memory_space=pltpu.MemorySpace.SMEM),
            ],
            out_specs=pl.BlockSpec((BMp, G), lambda i: (i, 0)),
        ),
        compiler_params=pltpu.CompilerParams(
            # Batch axis is embarrassingly parallel -> shards grid steps across
            # v7x's two TensorCores (harmless no-op on v5e / v6e).
            dimension_semantics=("parallel",),
            vmem_limit_bytes=32 * 1024 * 1024,
        ),
    )(xp, w_rows, b)

    # (Bp//G, G) -> (Bp, 1) is a pure row-major reshape, so row order is
    # preserved; padded tail rows are sliced off.
    return out.reshape(Bp, 1)[:B]


if __name__ == "__main__":
    # Small shapes consistent with LogisticRegression(n_input_features=32).
    # NOTE (perf): this size is purely a correctness check -- at batch=8 the call
    # is ~100% launch/step overhead.  Benchmark/tune at >= 64K rows, where the
    # batch-grid streaming pipeline above is what actually matters.
    batch, n_features = 8, 32

    key = jax.random.PRNGKey(0)
    kx, kw, kb = jax.random.split(key, 3)

    x = jax.random.normal(kx, (batch, n_features), dtype=jnp.float32)

    # PyTorch nn.Linear default init: U(-1/sqrt(F), 1/sqrt(F)).
    bound = 1.0 / jnp.sqrt(jnp.float32(n_features))
    w = jax.random.uniform(kw, (n_features, 1), dtype=jnp.float32,
                           minval=-bound, maxval=bound)
    b = jax.random.uniform(kb, (1, 1), dtype=jnp.float32,
                           minval=-bound, maxval=bound)

    y = logistic_regression(x, w, b)
    y = jax.block_until_ready(y)

    # Reference in plain JAX.
    y_ref = jax.nn.sigmoid(x @ w + b)
    assert y.shape == (batch, 1)
    # Slightly relaxed tolerance because of the EUP approximate reciprocal.
    assert jnp.allclose(y, y_ref, atol=2e-3, rtol=2e-3)

    print("KERNEL_OK")
</pallas_src>

<mosaic_0001>
module attributes {stable_mosaic.version = 11 : i64} {
  func.func @logistic_kernel(%arg0: i32, %arg1: memref<8x128xf32, #tpu.memory_space<vmem>>, %arg2: memref<4x128xf32, #tpu.memory_space<vmem>>, %arg3: memref<1x1xf32, #tpu.memory_space<smem>>, %arg4: memref<8x4xf32, #tpu.memory_space<vmem>>) attributes {dimension_semantics = [#tpu.dimension_semantics<parallel>], iteration_bounds = array<i64: 1>, scalar_prefetch = 0 : i64, scratch_operands = 0 : i64, tpu.core_type = #tpu.core_type<tc>, window_params = [{transform_indices = @transform_0, window_bounds = array<i64: 8, 128>}, {pipeline_mode = #tpu.pipeline_mode<synchronous>, transform_indices = @transform_1, window_bounds = array<i64: 4, 128>}, {transform_indices = @transform_2, window_bounds = array<i64: 1, 1>}, {transform_indices = @transform_3, window_bounds = array<i64: 8, 4>}]} {
    %c0 = arith.constant 0 : index
    %c0_0 = arith.constant 0 : index
    %0 = vector.load %arg1[%c0, %c0_0] : memref<8x128xf32, #tpu.memory_space<vmem>>, vector<8x128xf32>
    %c0_1 = arith.constant 0 : index
    %c0_2 = arith.constant 0 : index
    %1 = vector.load %arg2[%c0_1, %c0_2] : memref<4x128xf32, #tpu.memory_space<vmem>>, vector<4x128xf32>
    %c0_3 = arith.constant 0 : index
    %c0_4 = arith.constant 0 : index
    %2 = memref.load %arg3[%c0_3, %c0_4] : memref<1x1xf32, #tpu.memory_space<smem>>
    %3 = vector.extract_strided_slice %1 {offsets = [0, 0], sizes = [1, 128], strides = [1, 1]} : vector<4x128xf32> to vector<1x128xf32>
    %4 = vector.broadcast %3 : vector<1x128xf32> to vector<8x128xf32>
    %5 = arith.mulf %0, %4 : vector<8x128xf32>
    %cst = arith.constant dense<0.000000e+00> : vector<8xf32>
    %6 = vector.multi_reduction <add>, %5, %cst [1] : vector<8x128xf32> to vector<8xf32>
    %7 = vector.shape_cast %6 : vector<8xf32> to vector<8x1xf32>
    %8 = vector.broadcast %2 : f32 to vector<8x1xf32>
    %9 = arith.addf %7, %8 : vector<8x1xf32>
    %cst_5 = arith.constant 0.000000e+00 : f32
    %10 = vector.broadcast %cst_5 : f32 to vector<8x1xf32>
    %11 = arith.subf %10, %9 : vector<8x1xf32>
    %12 = math.exp %11 : vector<8x1xf32>
    %cst_6 = arith.constant 1.000000e+00 : f32
    %13 = vector.broadcast %cst_6 : f32 to vector<8x1xf32>
    %14 = arith.addf %13, %12 : vector<8x1xf32>
    %15 = tpu.reciprocal %14 {approx = true} : vector<8x1xf32> -> vector<8x1xf32>
    %c0_7 = arith.constant 0 : index
    %c0_8 = arith.constant 0 : index
    %16 = vector.load %arg4[%c0_7, %c0_8] : memref<8x4xf32, #tpu.memory_space<vmem>>, vector<8x1xf32>
    tpu.vector_store %arg4[%c0_7, %c0_8], %15 {strides = array<i32>} : memref<8x4xf32, #tpu.memory_space<vmem>>, vector<8x1xf32>,
    %17 = vector.extract_strided_slice %1 {offsets = [1, 0], sizes = [1, 128], strides = [1, 1]} : vector<4x128xf32> to vector<1x128xf32>
    %18 = vector.broadcast %17 : vector<1x128xf32> to vector<8x128xf32>
    %19 = arith.mulf %0, %18 : vector<8x128xf32>
    %cst_9 = arith.constant dense<0.000000e+00> : vector<8xf32>
    %20 = vector.multi_reduction <add>, %19, %cst_9 [1] : vector<8x128xf32> to vector<8xf32>
    %21 = vector.shape_cast %20 : vector<8xf32> to vector<8x1xf32>
    %22 = vector.broadcast %2 : f32 to vector<8x1xf32>
    %23 = arith.addf %21, %22 : vector<8x1xf32>
    %cst_10 = arith.constant 0.000000e+00 : f32
    %24 = vector.broadcast %cst_10 : f32 to vector<8x1xf32>
    %25 = arith.subf %24, %23 : vector<8x1xf32>
    %26 = math.exp %25 : vector<8x1xf32>
    %cst_11 = arith.constant 1.000000e+00 : f32
    %27 = vector.broadcast %cst_11 : f32 to vector<8x1xf32>
    %28 = arith.addf %27, %26 : vector<8x1xf32>
    %29 = tpu.reciprocal %28 {approx = true} : vector<8x1xf32> -> vector<8x1xf32>
    %c0_12 = arith.constant 0 : index
    %c1 = arith.constant 1 : index
    %30 = vector.load %arg4[%c0_12, %c1] : memref<8x4xf32, #tpu.memory_space<vmem>>, vector<8x1xf32>
    tpu.vector_store %arg4[%c0_12, %c1], %29 {strides = array<i32>} : memref<8x4xf32, #tpu.memory_space<vmem>>, vector<8x1xf32>,
    %31 = vector.extract_strided_slice %1 {offsets = [2, 0], sizes = [1, 128], strides = [1, 1]} : vector<4x128xf32> to vector<1x128xf32>
    %32 = vector.broadcast %31 : vector<1x128xf32> to vector<8x128xf32>
    %33 = arith.mulf %0, %32 : vector<8x128xf32>
    %cst_13 = arith.constant dense<0.000000e+00> : vector<8xf32>
    %34 = vector.multi_reduction <add>, %33, %cst_13 [1] : vector<8x128xf32> to vector<8xf32>
    %35 = vector.shape_cast %34 : vector<8xf32> to vector<8x1xf32>
    %36 = vector.broadcast %2 : f32 to vector<8x1xf32>
    %37 = arith.addf %35, %36 : vector<8x1xf32>
    %cst_14 = arith.constant 0.000000e+00 : f32
    %38 = vector.broadcast %cst_14 : f32 to vector<8x1xf32>
    %39 = arith.subf %38, %37 : vector<8x1xf32>
    %40 = math.exp %39 : vector<8x1xf32>
    %cst_15 = arith.constant 1.000000e+00 : f32
    %41 = vector.broadcast %cst_15 : f32 to vector<8x1xf32>
    %42 = arith.addf %41, %40 : vector<8x1xf32>
    %43 = tpu.reciprocal %42 {approx = true} : vector<8x1xf32> -> vector<8x1xf32>
    %c0_16 = arith.constant 0 : index
    %c2 = arith.constant 2 : index
    %44 = vector.load %arg4[%c0_16, %c2] : memref<8x4xf32, #tpu.memory_space<vmem>>, vector<8x1xf32>
    tpu.vector_store %arg4[%c0_16, %c2], %43 {strides = array<i32>} : memref<8x4xf32, #tpu.memory_space<vmem>>, vector<8x1xf32>,
    %45 = vector.extract_strided_slice %1 {offsets = [3, 0], sizes = [1, 128], strides = [1, 1]} : vector<4x128xf32> to vector<1x128xf32>
    %46 = vector.broadcast %45 : vector<1x128xf32> to vector<8x128xf32>
    %47 = arith.mulf %0, %46 : vector<8x128xf32>
    %cst_17 = arith.constant dense<0.000000e+00> : vector<8xf32>
    %48 = vector.multi_reduction <add>, %47, %cst_17 [1] : vector<8x128xf32> to vector<8xf32>
    %49 = vector.shape_cast %48 : vector<8xf32> to vector<8x1xf32>
    %50 = vector.broadcast %2 : f32 to vector<8x1xf32>
    %51 = arith.addf %49, %50 : vector<8x1xf32>
    %cst_18 = arith.constant 0.000000e+00 : f32
    %52 = vector.broadcast %cst_18 : f32 to vector<8x1xf32>
    %53 = arith.subf %52, %51 : vector<8x1xf32>
    %54 = math.exp %53 : vector<8x1xf32>
    %cst_19 = arith.constant 1.000000e+00 : f32
    %55 = vector.broadcast %cst_19 : f32 to vector<8x1xf32>
    %56 = arith.addf %55, %54 : vector<8x1xf32>
    %57 = tpu.reciprocal %56 {approx = true} : vector<8x1xf32> -> vector<8x1xf32>
    %c0_20 = arith.constant 0 : index
    %c3 = arith.constant 3 : index
    %58 = vector.load %arg4[%c0_20, %c3] : memref<8x4xf32, #tpu.memory_space<vmem>>, vector<8x1xf32>
    tpu.vector_store %arg4[%c0_20, %c3], %57 {strides = array<i32>} : memref<8x4xf32, #tpu.memory_space<vmem>>, vector<8x1xf32>,
    return
  }
  func.func @transform_0(%arg0: i32) -> (i32, i32) {
    %c0_i32 = arith.constant 0 : i32
    %c0_i32_0 = arith.constant 0 : i32
    return %arg0, %c0_i32 : i32, i32
  }
  func.func @transform_1(%arg0: i32) -> (i32, i32) {
    %c0_i32 = arith.constant 0 : i32
    %c0_i32_0 = arith.constant 0 : i32
    %c0_i32_1 = arith.constant 0 : i32
    return %c0_i32, %c0_i32_0 : i32, i32
  }
  func.func @transform_2(%arg0: i32) -> (i32, i32) {
    %c0_i32 = arith.constant 0 : i32
    %c0_i32_0 = arith.constant 0 : i32
    %c0_i32_1 = arith.constant 0 : i32
    return %c0_i32, %c0_i32_0 : i32, i32
  }
  func.func @transform_3(%arg0: i32) -> (i32, i32) {
    %c0_i32 = arith.constant 0 : i32
    %c0_i32_0 = arith.constant 0 : i32
    return %arg0, %c0_i32 : i32, i32
  }
}

</mosaic_0001>

<bundles_post_ra>
// kernel: tpu_custom_call.1
= control target key start
LH: loop header
LB: loop body
LE: loop exit
PB: predicated region body
PF: predicated region fallthrough
CT: control target
= control target key end

     0   :  { %9 = vsyncpa [#allocation4], 0  ;;  %s137_s12 = smov [#allocation3]   ;;  %s188_s0 = inlined_call_operand.hbm [shape: f32[8,128], index: 0, kind: input, shape index: {}]   ;;  %s189_s1 = inlined_call_operand.vmem [shape: f32[4,128], index: 1, kind: input, shape index: {}]   ;;  %s190_s2 = inlined_call_operand.<no memory space> [shape: f32[1,1], index: 2, kind: input, shape index: {}]   ;;  %s191_s3 = inlined_call_operand.vmem [shape: f32[8,4], index: 3, kind: output, shape index: {}]  }
   0x1   :  { %s16_s13 = sshll.u32 %s137_s12, 4  ;;  %s113_s16 = scalar_lea.hbm %s188_s0, 128  ;;  %s17_s13 = int_to_ptr.vmem [resolvable:$true] %s16_s13 }
   0x2   :  { %p114_p0 = scmp.ne.s32.totalorder %s188_s0, %s113_s16  ;;  %p117_p1 = scmp.lt.u32.totalorder %s113_s16, %s188_s0 }
   0x4   :  { %p119_p2 = pnand %p117_p1, %p114_p0 }
   0x6   :  { %122 = shalt.err (!%p119_p2)
}
   0x7   :  { %s123_s21 = scalar_lea.vmem %s17_s13, 128  ;;  %p128_p4 = scmp.lt.s32.totalorder %s17_s13, %s17_s13 }
   0x8   :  { %p124_p3 = scmp.ne.s32.totalorder %s17_s13, %s123_s21  ;;  %p129_p5 = scmp.lt.s32.totalorder %s123_s21, %s123_s21 }
   0xa   :  { %p130_p6 = por %p129_p5, %p128_p4 }
   0xc   :  { %p131_p7 = pnand %p130_p6, %p124_p3 }
   0xe   :  { %134 = shalt.err (!%p131_p7)
}
   0xf   :  { %19 = dma.hbm_to_vmem [thread:$0]  %s188_s0, 128, %s17_s13, [#allocation4]  }
  0x10   :  { %135 = dma.done.wait [#allocation4], 128  }
  0x11   :  { %136 = vsyncadd [#allocation4], 4294967168  ;;  %v30_v0 = vlaneseq  ;;  %v27_v6 = vld [vmem:[#allocation3] sm:$0xff]  ;;  %v37_v16 = vstv %s190_s2  ;;  %vm44_vm0 = vcmask 7168   ;;  %vm59_vm1 = vcmask 15368  }
  0x12   :  { %v28_v7 = vld [vmem:[%s189_s1] sm:$0xf]  ;;  %vm74_vm2 = vcmask 23568   ;;  %vm89_vm3 = vcmask 31768  }
  0x13   :  { %v31_v1 = vshrl.u32 %v30_v0, 7 }
  0x15   :  { %v32_v2 = vsub.s32 0, %v31_v1  ;;  %v63_v3 = vsub.s32 2, %v31_v1  ;;  %v48_v4 = vsub.s32 1, %v31_v1  ;;  %v78_v5 = vsub.s32 3, %v31_v1 }
  0x17   :  { %v33_v8 = vrot.slane %v28_v7, %v32_v2  ;;  %v64_v9 = vrot.slane %v28_v7, %v63_v3  ;;  %v49_v10 = vrot.slane %v28_v7, %v48_v4  ;;  %v79_v11 = vrot.slane %v28_v7, %v78_v5 }
  0x19   :  { %v34_v12 = vmul.f32 %v33_v8, %v27_v6  ;;  %v65_v13 = vmul.f32 %v64_v9, %v27_v6  ;;  %v50_v14 = vmul.f32 %v49_v10, %v27_v6  ;;  %v80_v15 = vmul.f32 %v79_v11, %v27_v6 }
  0x1b   :  { %35 = vadd.xlane.f32.xlu0 %v34_v12  ;;  %66 = vadd.xlane.f32.xlu1 %v65_v13 }
  0x1f   :  { %51 = vadd.xlane.f32.xlu0 %v50_v14  ;;  %81 = vadd.xlane.f32.xlu1 %v80_v15 }
  0xa8   :  { %v36_v17 = vpop.xlane.xlu0 %35  ;;  %v67_v18 = vpop.xlane.xlu1 %66 }
  0xa9   :  { %v38_v19 = vadd.f32 %v37_v16, %v36_v17  ;;  %v68_v20 = vadd.f32 %v67_v18, %v37_v16 }
  0xab   :  { %v39_v21 = vsub.f32 0.0, %v38_v19  ;;  %v69_v22 = vsub.f32 0.0, %v68_v20 }
  0xac   :  { %v52_v23 = vpop.xlane.xlu0 %51  ;;  %v82_v24 = vpop.xlane.xlu1 %81 }
  0xad   :  { %v40_v25 = vmul.f32 1.442695, %v39_v21  ;;  %v70_v26 = vmul.f32 1.442695, %v69_v22  ;;  %v53_v27 = vadd.f32 %v52_v23, %v37_v16  ;;  %v83_v28 = vadd.f32 %v82_v24, %v37_v16 }
  0xaf   :  { %97 = vpow2.f32 %v40_v25  ;;  %v54_v29 = vsub.f32 0.0, %v53_v27  ;;  %v84_v30 = vsub.f32 0.0, %v83_v28 }
  0xb0   :  { %99 = vpow2.f32 %v70_v26 }
  0xb1   :  { %v55_v31 = vmul.f32 1.442695, %v54_v29  ;;  %v85_v32 = vmul.f32 1.442695, %v84_v30 }
  0xb3   :  { %101 = vpow2.f32 %v55_v31 }
  0xb4   :  { %103 = vpow2.f32 %v85_v32 }
  0xb9   :  { %v98_v33 = vpop.eup %97 }
  0xba   :  { %v100_v34 = vpop.eup %99  ;;  %v42_v35 = vadd.f32 1.0, %v98_v33 }
  0xbb   :  { %v72_v36 = vadd.f32 1.0, %v100_v34 }
  0xbc   :  { %105 = vrcp.f32 %v42_v35 }
  0xbd   :  { %v102_v37 = vpop.eup %101  ;;  %107 = vrcp.f32 %v72_v36 }
  0xbe   :  { %v104_v38 = vpop.eup %103  ;;  %v57_v39 = vadd.f32 1.0, %v102_v37 }
  0xbf   :  { %v87_v40 = vadd.f32 1.0, %v104_v38 }
  0xc0   :  { %109 = vrcp.f32 %v57_v39 }
  0xc1   :  { %111 = vrcp.f32 %v87_v40 }
  0xc6   :  { %v106_v41 = vpop.eup %105 }
  0xc7   :  { %45 = vst.msk [vmem:[%s191_s3] sm:$0xff] %vm44_vm0, %v106_v41  ;;  %v108_v42 = vpop.eup %107 }
  0xca   :  { %v110_v43 = vpop.eup %109 }
  0xcb   :  { %v112_v44 = vpop.eup %111  ;;  %60 = vst.msk [vmem:[%s191_s3] sm:$0xff] %vm59_vm1, %v110_v43 }
  0xcc   :  { %75 = vst.msk [vmem:[%s191_s3] sm:$0xff] %vm74_vm2, %v108_v42 }
  0xcd   :  { %90 = vst.msk [vmem:[%s191_s3] sm:$0xff] %vm89_vm3, %v112_v44 }
  0xce   :  { %95 = vsyncpa [#allocation4], 1 }

</bundles_post_ra>
